<compile_context>
chip_gen: v5e
topology: v5e:2x2
jax: 0.10.0
libtpu: 0.0.40
codegen_flags: <defaults>
</compile_context>

<pallas_src>
import jax
import jax.numpy as jnp
from jax.experimental import pallas as pl
from jax.experimental.pallas import tpu as pltpu


def _round_up(x, m):
    return ((x + m - 1) // m) * m


def _gate_kernel(x_ref, w1_ref, b1_ref, w2_ref, b2_ref, o_ref):
    # x_ref: (tm, D)   w*_ref: (D, tn)   b*_ref: (1, tn)   o_ref: (tm, tn)
    x = x_ref[...]
    h1 = jnp.dot(x, w1_ref[...], preferred_element_type=jnp.float32)
    h1 = h1 + b1_ref[...].astype(jnp.float32)
    h2 = jnp.dot(x, w2_ref[...], preferred_element_type=jnp.float32)
    h2 = h2 + b2_ref[...].astype(jnp.float32)
    o_ref[...] = (jax.nn.sigmoid(h1) * h2).astype(o_ref.dtype)


def prepare_gate_params(w1, b1, w2, b2, param_dtype=None):
    """One-time parameter prep (do this at init, not per forward call).

    w1/w2: PyTorch nn.Linear layout [out_features, in_features]; b1/b2: [out].
    Returns (w1_t, b1_2d, w2_t, b2_2d) with weights in [D_in, D_out] layout so the
    kernel computes x @ W directly on the MXU.  Optionally cast params to bf16
    (accumulation stays f32 inside the kernel via preferred_element_type).
    """
    w1_t = jnp.transpose(w1)
    w2_t = jnp.transpose(w2)
    D = w1_t.shape[1]
    b1_2d = b1.reshape(1, D)
    b2_2d = b2.reshape(1, D)
    if param_dtype is not None:
        w1_t = w1_t.astype(param_dtype)
        w2_t = w2_t.astype(param_dtype)
        b1_2d = b1_2d.astype(param_dtype)
        b2_2d = b2_2d.astype(param_dtype)
    return w1_t, b1_2d, w2_t, b2_2d


def _choose_tiles(M, D, itemsize, vmem_budget_bytes=24 * 1024 * 1024):
    """Pick (tm, tn).  Prefer tn == D (weights fully resident in VMEM, fetched
    once) and the largest row tile that keeps the double-buffered working set
    within a budget valid on every generation (v7x only has 64 MiB VMEM)."""
    m_cap = _round_up(min(max(M, 8), 1024), 8)

    if D % 128 == 0:
        # Full D first (weights resident), then lane-aligned divisors of D.
        tn_candidates = [D] + [t for t in (1024, 512, 256, 128) if t < D and D % t == 0]
    else:
        # Non-lane-aligned feature dims: block must equal the full dim.
        tn_candidates = [D]

    def usage(tm_, tn_):
        per_buffer = (tm_ * D          # x row tile
                      + 2 * D * tn_    # W1, W2 column tiles
                      + 2 * tn_        # biases
                      + tm_ * tn_      # output tile
                      ) * itemsize
        return 2 * per_buffer          # double buffering

    best = None
    for tn in tn_candidates:
        tm = m_cap
        while tm > 8 and usage(tm, tn) > vmem_budget_bytes:
            tm = max(8, (tm // 2 // 8) * 8)
        if usage(tm, tn) <= vmem_budget_bytes:
            if tm >= min(256, m_cap):
                return tm, tn          # good row tile -> take the widest tn
            if best is None:
                best = (tm, tn)        # remember, but try a narrower tn first
    if best is not None:
        return best
    return 8, tn_candidates[-1]


def gate_forward(x, w1_t, b1_2d, w2_t, b2_2d, *, tm=None, tn=None):
    """x: [..., D]; w1_t/w2_t: [D, D] pre-transposed ([D_in, D_out]); b*_2d: [1, D]."""
    orig_shape = x.shape
    D = orig_shape[-1]
    x2 = x.reshape(-1, D)
    M = x2.shape[0]

    itemsize = max(jnp.dtype(x.dtype).itemsize, jnp.dtype(w1_t.dtype).itemsize)
    auto_tm, auto_tn = _choose_tiles(M, D, itemsize)
    if tm is None:
        tm = auto_tm
    if tn is None:
        tn = auto_tn
    assert tm % 8 == 0, "row tile must be a multiple of the 8-sublane tile"
    assert D % tn == 0, "feature tile must divide the feature dim"

    # Pad rows to a multiple of tm instead of forcing awkward divisors of M.
    M_pad = _round_up(M, tm)
    if M_pad != M:
        x2 = jnp.pad(x2, ((0, M_pad - M), (0, 0)))

    # Column blocks OUTER, row blocks INNER: weight blocks keep the same block
    # index across the inner axis, so Pallas fetches each weight tile from HBM
    # exactly once and keeps it resident while x row tiles stream through.
    grid = (D // tn, M_pad // tm)

    out2 = pl.pallas_call(
        _gate_kernel,
        out_shape=jax.ShapeDtypeStruct((M_pad, D), x.dtype),
        grid_spec=pltpu.PrefetchScalarGridSpec(
            num_scalar_prefetch=0,
            grid=grid,
            in_specs=[
                pl.BlockSpec((tm, D), lambda j, i: (i, 0)),   # x row tile (streams)
                pl.BlockSpec((D, tn), lambda j, i: (0, j)),   # W1^T column tile (resident per j)
                pl.BlockSpec((1, tn), lambda j, i: (0, j)),   # b1 slice
                pl.BlockSpec((D, tn), lambda j, i: (0, j)),   # W2^T column tile (resident per j)
                pl.BlockSpec((1, tn), lambda j, i: (0, j)),   # b2 slice
            ],
            out_specs=pl.BlockSpec((tm, tn), lambda j, i: (i, j)),
        ),
        compiler_params=pltpu.CompilerParams(
            # Both axes independent (no accumulation) -> shard across cores.
            dimension_semantics=("parallel", "parallel"),
            vmem_limit_bytes=32 * 1024 * 1024,
        ),
    )(x2, w1_t, b1_2d, w2_t, b2_2d)

    if M_pad != M:
        out2 = out2[:M]
    return out2.reshape(orig_shape)


def _ref_gate(x, w1, b1, w2, b2):
    return jax.nn.sigmoid(x @ w1.T + b1) * (x @ w2.T + b2)


if __name__ == "__main__":
    key = jax.random.PRNGKey(0)
    batch, seq, dim = 2, 8, 32

    k_x, k_w1, k_b1, k_w2, k_b2, k_x2, k_w3, k_x3 = jax.random.split(key, 8)
    x = jax.random.normal(k_x, (batch, seq, dim), dtype=jnp.float32)

    # PyTorch nn.Linear init shapes: weight [out, in], bias [out].
    bound = 1.0 / (dim ** 0.5)
    w1 = jax.random.uniform(k_w1, (dim, dim), minval=-bound, maxval=bound, dtype=jnp.float32)
    b1 = jax.random.uniform(k_b1, (dim,), minval=-bound, maxval=bound, dtype=jnp.float32)
    w2 = jax.random.uniform(k_w2, (dim, dim), minval=-bound, maxval=bound, dtype=jnp.float32)
    b2 = jax.random.uniform(k_b2, (dim,), minval=-bound, maxval=bound, dtype=jnp.float32)

    # One-time param prep (transpose once; no per-call HBM transposes).
    params = prepare_gate_params(w1, b1, w2, b2)

    out = jax.block_until_ready(gate_forward(x, *params))
    ref = _ref_gate(x, w1, b1, w2, b2)
    assert out.shape == x.shape
    assert jnp.allclose(out, ref, atol=1e-5, rtol=1e-5), "mismatch vs reference"

    # Padded path: M = 15 rows (not a multiple of the row tile).
    x_odd = jax.random.normal(k_x2, (3, 5, dim), dtype=jnp.float32)
    out_odd = jax.block_until_ready(gate_forward(x_odd, *params))
    ref_odd = _ref_gate(x_odd, w1, b1, w2, b2)
    assert out_odd.shape == x_odd.shape
    assert jnp.allclose(out_odd, ref_odd, atol=1e-5, rtol=1e-5), "padded-path mismatch"

    # Lane-aligned path: dim = 256 (weights fully resident, tn == D).
    dim2 = 256
    bound2 = 1.0 / (dim2 ** 0.5)
    w1b = jax.random.uniform(k_w3, (dim2, dim2), minval=-bound2, maxval=bound2, dtype=jnp.float32)
    b1b = jnp.zeros((dim2,), dtype=jnp.float32)
    w2b = jax.random.uniform(k_b2, (dim2, dim2), minval=-bound2, maxval=bound2, dtype=jnp.float32)
    b2b = jnp.zeros((dim2,), dtype=jnp.float32)
    xb = jax.random.normal(k_x3, (4, 100, dim2), dtype=jnp.float32)
    params_b = prepare_gate_params(w1b, b1b, w2b, b2b)
    out_b = jax.block_until_ready(gate_forward(xb, *params_b))
    ref_b = _ref_gate(xb, w1b, b1b, w2b, b2b)
    assert out_b.shape == xb.shape
    assert jnp.allclose(out_b, ref_b, atol=1e-4, rtol=1e-4), "aligned-path mismatch"

    print("KERNEL_OK")
</pallas_src>

<mosaic_0001>
module attributes {stable_mosaic.version = 11 : i64} {
  func.func @_gate_kernel(%arg0: i32, %arg1: i32, %arg2: memref<16x32xf32, #tpu.memory_space<vmem>>, %arg3: memref<32x32xf32, #tpu.memory_space<vmem>>, %arg4: memref<1x32xf32, #tpu.memory_space<vmem>>, %arg5: memref<32x32xf32, #tpu.memory_space<vmem>>, %arg6: memref<1x32xf32, #tpu.memory_space<vmem>>, %arg7: memref<16x32xf32, #tpu.memory_space<vmem>>) attributes {dimension_semantics = [#tpu.dimension_semantics<parallel>, #tpu.dimension_semantics<parallel>], iteration_bounds = array<i64: 1, 1>, scalar_prefetch = 0 : i64, scratch_operands = 0 : i64, tpu.core_type = #tpu.core_type<tc>, window_params = [{transform_indices = @transform_0, window_bounds = array<i64: 16, 32>}, {transform_indices = @transform_1, window_bounds = array<i64: 32, 32>}, {transform_indices = @transform_2, window_bounds = array<i64: 1, 32>}, {transform_indices = @transform_3, window_bounds = array<i64: 32, 32>}, {transform_indices = @transform_4, window_bounds = array<i64: 1, 32>}, {transform_indices = @transform_5, window_bounds = array<i64: 16, 32>}]} {
    %c0 = arith.constant 0 : index
    %c0_0 = arith.constant 0 : index
    %0 = vector.load %arg2[%c0, %c0_0] : memref<16x32xf32, #tpu.memory_space<vmem>>, vector<16x32xf32>
    %c0_1 = arith.constant 0 : index
    %c0_2 = arith.constant 0 : index
    %1 = vector.load %arg3[%c0_1, %c0_2] : memref<32x32xf32, #tpu.memory_space<vmem>>, vector<32x32xf32>
    %cst = arith.constant dense<0.000000e+00> : vector<16x32xf32>
    %2 = tpu.matmul %0, %1, %cst {dimension_numbers = #tpu.dot_dimension_numbers<[1], [0], [0], [1], [0, 0, 1, 1], [], []>} : vector<16x32xf32>, vector<32x32xf32>, vector<16x32xf32> -> vector<16x32xf32>
    %c0_3 = arith.constant 0 : index
    %c0_4 = arith.constant 0 : index
    %3 = vector.load %arg4[%c0_3, %c0_4] : memref<1x32xf32, #tpu.memory_space<vmem>>, vector<1x32xf32>
    %4 = vector.broadcast %3 : vector<1x32xf32> to vector<16x32xf32>
    %5 = arith.addf %2, %4 : vector<16x32xf32>
    %c0_5 = arith.constant 0 : index
    %c0_6 = arith.constant 0 : index
    %6 = vector.load %arg5[%c0_5, %c0_6] : memref<32x32xf32, #tpu.memory_space<vmem>>, vector<32x32xf32>
    %cst_7 = arith.constant dense<0.000000e+00> : vector<16x32xf32>
    %7 = tpu.matmul %0, %6, %cst_7 {dimension_numbers = #tpu.dot_dimension_numbers<[1], [0], [0], [1], [0, 0, 1, 1], [], []>} : vector<16x32xf32>, vector<32x32xf32>, vector<16x32xf32> -> vector<16x32xf32>
    %c0_8 = arith.constant 0 : index
    %c0_9 = arith.constant 0 : index
    %8 = vector.load %arg6[%c0_8, %c0_9] : memref<1x32xf32, #tpu.memory_space<vmem>>, vector<1x32xf32>
    %9 = vector.broadcast %8 : vector<1x32xf32> to vector<16x32xf32>
    %10 = arith.addf %7, %9 : vector<16x32xf32>
    %11 = arith.negf %5 : vector<16x32xf32>
    %12 = math.exp %11 : vector<16x32xf32>
    %cst_10 = arith.constant 1.000000e+00 : f32
    %13 = vector.broadcast %cst_10 : f32 to vector<16x32xf32>
    %14 = arith.addf %13, %12 : vector<16x32xf32>
    %15 = arith.divf %13, %14 : vector<16x32xf32>
    %16 = arith.mulf %15, %10 : vector<16x32xf32>
    %c0_11 = arith.constant 0 : index
    %c0_12 = arith.constant 0 : index
    %17 = vector.load %arg7[%c0_11, %c0_12] : memref<16x32xf32, #tpu.memory_space<vmem>>, vector<16x32xf32>
    tpu.vector_store %arg7[%c0_11, %c0_12], %16 {strides = array<i32>} : memref<16x32xf32, #tpu.memory_space<vmem>>, vector<16x32xf32>,
    return
  }
  func.func @transform_0(%arg0: i32, %arg1: i32) -> (i32, i32) {
    %c0_i32 = arith.constant 0 : i32
    %c0_i32_0 = arith.constant 0 : i32
    return %arg1, %c0_i32 : i32, i32
  }
  func.func @transform_1(%arg0: i32, %arg1: i32) -> (i32, i32) {
    %c0_i32 = arith.constant 0 : i32
    %c0_i32_0 = arith.constant 0 : i32
    return %c0_i32, %arg0 : i32, i32
  }
  func.func @transform_2(%arg0: i32, %arg1: i32) -> (i32, i32) {
    %c0_i32 = arith.constant 0 : i32
    %c0_i32_0 = arith.constant 0 : i32
    return %c0_i32, %arg0 : i32, i32
  }
  func.func @transform_3(%arg0: i32, %arg1: i32) -> (i32, i32) {
    %c0_i32 = arith.constant 0 : i32
    %c0_i32_0 = arith.constant 0 : i32
    return %c0_i32, %arg0 : i32, i32
  }
  func.func @transform_4(%arg0: i32, %arg1: i32) -> (i32, i32) {
    %c0_i32 = arith.constant 0 : i32
    %c0_i32_0 = arith.constant 0 : i32
    return %c0_i32, %arg0 : i32, i32
  }
  func.func @transform_5(%arg0: i32, %arg1: i32) -> (i32, i32) {
    %c0_i32 = arith.constant 0 : i32
    return %arg1, %arg0 : i32, i32
  }
}

</mosaic_0001>

<bundles_post_ra>
// kernel: tpu_custom_call.1
= control target key start
LH: loop header
LB: loop body
LE: loop exit
PB: predicated region body
PF: predicated region fallthrough
CT: control target
= control target key end

     0   :  { %10 = vsyncpa [#allocation3], 0  ;;  %s405_s0 = inlined_call_operand.hbm [shape: f32[16,32], index: 0, kind: input, shape index: {}]   ;;  %s406_s1 = inlined_call_operand.hbm [shape: f32[32,32], index: 1, kind: input, shape index: {}]   ;;  %s407_s2 = inlined_call_operand.vmem [shape: f32[1,32], index: 2, kind: input, shape index: {}]   ;;  %s408_s3 = inlined_call_operand.hbm [shape: f32[32,32], index: 3, kind: input, shape index: {}]   ;;  %s409_s4 = inlined_call_operand.vmem [shape: f32[1,32], index: 4, kind: input, shape index: {}]   ;;  %s410_s5 = inlined_call_operand.hbm [shape: f32[16,32], index: 5, kind: output, shape index: {}]  }
   0x1   :  { %11 = vsyncpa [#allocation6], 0 }
   0x2   :  { %12 = vsyncpa [#allocation4], 0  ;;  %s30_s20 = sshll.u32 %s406_s1, 4  ;;  %s333_s21 = smov [#allocation5]   ;;  %s31_s20 = int_to_ptr.hbm [resolvable:$true] %s30_s20 }
   0x3   :  { %s32_s22 = sshll.u32 %s333_s21, 4  ;;  %s17_s25 = sshll.u32 %s405_s0, 4  ;;  %s33_s22 = int_to_ptr.vmem [resolvable:$true] %s32_s22  ;;  %s18_s25 = int_to_ptr.hbm [resolvable:$true] %s17_s25 }
   0x4   :  { %s334_s26 = smov 128   ;;  %s335_s27 = smov 8  }
   0x5   :  { %38 = dma.hbm_to_vmem [thread:$0]  %s31_s20, 512, %s33_s22, [#allocation6], %s334_s26, %s334_s26, %s335_s27  }
   0x6   :  { %s336_s28 = smov [#allocation2]   ;;  %s45_s1 = sshll.u32 %s408_s3, 4  ;;  %s46_s1 = int_to_ptr.hbm [resolvable:$true] %s45_s1 }
   0x7   :  { %s19_s29 = sshll.u32 %s336_s28, 4  ;;  %s337_s0 = smov [#allocation7]   ;;  %s20_s29 = int_to_ptr.vmem [resolvable:$true] %s19_s29 }
   0x8   :  { %25 = dma.hbm_to_vmem [thread:$0]  %s18_s25, 256, %s20_s29, [#allocation3], %s334_s26, %s334_s26, %s335_s27  }
   0x9   :  { %s47_s7 = sshll.u32 %s337_s0, 4  ;;  %s48_s7 = int_to_ptr.vmem [resolvable:$true] %s47_s7 }
   0xa   :  { %53 = dma.hbm_to_vmem [thread:$0]  %s46_s1, 512, %s48_s7, [#allocation6], %s334_s26, %s334_s26, %s335_s27  }
   0xb   :  { %327 = dma.done.wait [#allocation3], 256  }
   0xc   :  { %328 = vsyncadd [#allocation3], 4294967040 }
   0xd   :  { %329 = dma.done.wait [#allocation6], 1024  }
   0xe   :  { %330 = vsyncadd [#allocation6], 4294966272  ;;  %v73_v0 = vld [vmem:[#allocation5 + $0x18] sm:$0xff]  ;;  %v72_v1 = vld [vmem:[#allocation5 + $0x10] sm:$0xff]  ;;  %vm78_vm0 = vcmask 261120   ;;  %s187_s13 = sshll.u32 %s410_s5, 4  ;;  %s188_s13 = int_to_ptr.hbm [resolvable:$true] %s187_s13 }
   0xf   :  { %97 = vmatpush.msra.mxu0 %v73_v0  ;;  %207 = vmatpush.msra.mxu2 %v73_v0  ;;  %v71_v2 = vld [vmem:[#allocation5 + $0x8] sm:$0xff]  ;;  %v111_v3 = vld [vmem:[#allocation7 + $0x18] sm:$0xff]  ;;  %v110_v4 = vld [vmem:[#allocation7 + $0x10] sm:$0xff] }
  0x10   :  { %v70_v5 = vld [vmem:[#allocation5] sm:$0xff]  ;;  %128 = vmatpush.msra.mxu1 %v111_v3  ;;  %211 = vmatpush.msra.mxu3 %v111_v3  ;;  %v68_v6 = vld [vmem:[#allocation2] sm:$0xff]  ;;  %v69_v7 = vld [vmem:[#allocation2 + $0x8] sm:$0xff] }
  0x11   :  { %98 = vmatpush.msra.mxu0 %v72_v1  ;;  %208 = vmatpush.msra.mxu2 %v72_v1  ;;  %v109_v8 = vld [vmem:[#allocation7 + $0x8] sm:$0xff]  ;;  %v108_v9 = vld [vmem:[#allocation7] sm:$0xff]  ;;  %v221_v10 = vld [vmem:[%s407_s2] ss:$0 sm:$0xff]  ;;  %s338_s2 = smov [#allocation8]  }
  0x12   :  { %129 = vmatpush.msra.mxu1 %v110_v4  ;;  %212 = vmatpush.msra.mxu3 %v110_v4  ;;  %v222_v23 = vld [vmem:[%s409_s4] ss:$0 sm:$0xff]  ;;  %s185_s4 = sshll.u32 %s338_s2, 4  ;;  %s186_s4 = int_to_ptr.vmem [resolvable:$true] %s185_s4 }
  0x13   :  { %99 = vmatpush.msra.mxu0 %v71_v2  ;;  %209 = vmatpush.msra.mxu2 %v71_v2 }
  0x14   :  { %130 = vmatpush.msra.mxu1 %v109_v8  ;;  %213 = vmatpush.msra.mxu3 %v109_v8 }
  0x15   :  { %100 = vmatpush.msra.mxu0 %v70_v5  ;;  %210 = vmatpush.msra.mxu2 %v70_v5 }
  0x16   :  { %201 = vmatmul.msk.f32.vlgmr.msra.gmra.mxu0 %vm78_vm0, %v68_v6  ;;  %202 = vmatmul.msk.f32.vlgmr.msra.gmra.mxu2 %vm78_vm0, %v69_v7 }
  0x17   :  { %131 = vmatpush.msra.mxu1 %v108_v9  ;;  %214 = vmatpush.msra.mxu3 %v108_v9 }
  0x18   :  { %203 = vmatmul.msk.f32.vlgmr.msra.gmra.mxu1 %vm78_vm0, %v68_v6  ;;  %204 = vmatmul.msk.f32.vlgmr.msra.gmra.mxu3 %vm78_vm0, %v69_v7 }
  0x93   :  { %v102_v11 = vpop.f32.mrf.mxu0 }
  0x94   :  { %v103_v12 = vadd.f32 %v221_v10, %v102_v11 }
  0x95   :  { %v133_v25 = vpop.f32.mrf.mxu1 }
  0x96   :  { %v205_v13 = vmul.f32 -1.442695, %v103_v12  ;;  %v134_v30 = vadd.f32 %v222_v23, %v133_v25 }
  0x98   :  { %223 = vpow2.f32 %v205_v13 }
  0x99   :  { %v105_v14 = vpop.f32.mrf.mxu2 }
  0x9a   :  { %v106_v15 = vadd.f32 %v221_v10, %v105_v14 }
  0x9b   :  { %v136_v37 = vpop.f32.mrf.mxu3 }
  0x9c   :  { %v206_v16 = vmul.f32 -1.442695, %v106_v15  ;;  %v137_v42 = vadd.f32 %v222_v23, %v136_v37 }
  0x9e   :  { %v224_v17 = vpop.eup %223  ;;  %225 = vpow2.f32 %v206_v16 }
  0x9f   :  { %v145_v18 = vadd.f32 1.0, %v224_v17 }
  0xa1   :  { %227 = vrcp.f32 %v145_v18  ;;  %v158_v26 = vand.u32 2147483648, %v145_v18  ;;  %vm152_vm1 = vweird.f32 %v145_v18  ;;  %v156_v28 = vand.u32 2147483647, %v145_v18 }
  0xa3   :  { %v159_v33 = vor.u32 1.1754944e-38, %v158_v26  ;;  %vm157_vm4 = vcmp.eq.f32.partialorder %v156_v28, 8.507059e+37 }
  0xa4   :  { %v226_v19 = vpop.eup %225 }
  0xa5   :  { %v146_v20 = vadd.f32 1.0, %v226_v19 }
  0xa7   :  { %v228_v21 = vpop.eup %227  ;;  %229 = vrcp.f32 %v146_v20  ;;  %v173_v38 = vand.u32 2147483648, %v146_v20  ;;  %v171_v41 = vand.u32 2147483647, %v146_v20  ;;  %vm167_vm6 = vweird.f32 %v146_v20 }
  0xa8   :  { %v148_v22 = vmul.f32 %v228_v21, %v145_v18  ;;  %vm153_vm2 = vweird.f32 %v228_v21 }
  0xa9   :  { %vm154_vm3 = vmor %vm152_vm1, %vm153_vm2  ;;  %v174_v44 = vor.u32 1.1754944e-38, %v173_v38  ;;  %vm172_vm8 = vcmp.eq.f32.partialorder %v171_v41, 8.507059e+37 }
  0xaa   :  { %v149_v24 = vsub.f32 1.0, %v148_v22 }
  0xac   :  { %v150_v27 = vmul.f32 %v228_v21, %v149_v24 }
  0xad   :  { %v230_v29 = vpop.eup %229 }
  0xae   :  { %v151_v31 = vadd.f32 %v228_v21, %v150_v27  ;;  %v163_v32 = vmul.f32 %v230_v29, %v146_v20  ;;  %vm168_vm5 = vweird.f32 %v230_v29 }
  0xaf   :  { %vm169_vm7 = vmor %vm167_vm6, %vm168_vm5 }
  0xb0   :  { %v155_v34 = vsel %vm154_vm3, %v228_v21, %v151_v31  ;;  %v164_v35 = vsub.f32 1.0, %v163_v32 }
  0xb1   :  { %v160_v36 = vsel %vm157_vm4, %v159_v33, %v155_v34 }
  0xb2   :  { %v177_v39 = vmul.f32 %v160_v36, %v134_v30  ;;  %v165_v40 = vmul.f32 %v230_v29, %v164_v35 }
  0xb4   :  { %179 = vst.msk [vmem:[#allocation8] sm:$0xff] %vm78_vm0, %v177_v39  ;;  %v166_v43 = vadd.f32 %v230_v29, %v165_v40 }
  0xb6   :  { %v170_v45 = vsel %vm169_vm7, %v230_v29, %v166_v43 }
  0xb7   :  { %v175_v46 = vsel %vm172_vm8, %v174_v44, %v170_v45 }
  0xb8   :  { %v178_v47 = vmul.f32 %v175_v46, %v137_v42 }
  0xba   :  { %180 = vst.msk [vmem:[#allocation8 + $0x8] sm:$0xff] %vm78_vm0, %v178_v47 }
  0xbb   :  { %193 = dma.vmem_to_hbm [thread:$0]  %s186_s4, 256, %s188_s13, [#allocation4], %s334_s26, %s334_s26, %s335_s27  }
  0xbc   :  { %331 = dma.done.wait [#allocation4], 256  }
  0xbd   :  { %332 = vsyncadd [#allocation4], 4294967040 }
  0xbe   :  { %198 = vsyncpa [#allocation3], 1 }
  0xbf   :  { %199 = vsyncpa [#allocation6], 1 }
  0xc0   :  { %200 = vsyncpa [#allocation4], 1 }

</bundles_post_ra>
